<compile_context>
chip_gen: v7x
topology: tpu7x:2x2x1
jax: 0.10.0
libtpu: 0.0.40
codegen_flags: <defaults>
</compile_context>

<pallas_src>
import jax
import jax.numpy as jnp
from jax.experimental import pallas as pl
from jax.experimental.pallas import tpu as pltpu

LANES = 128
TARGET_BLOCK_BYTES = 4 * 1024 * 1024   # ~4 MiB of input per grid step
VMEM_LIMIT_BYTES = 32 * 1024 * 1024    # room for 2x(in+out) double buffers
MIN_GRID_STEPS = 4                     # keep steps for DMA overlap / 2 TCs


def _round_up(x, m):
    return ((x + m - 1) // m) * m


def _binary_tanh_kernel(x_ref, o_ref):
    x = x_ref[...]
    one = jnp.ones((), dtype=x.dtype)
    # hardtanh followed by sign-binarize == select on sign(x); dtype-preserving.
    o_ref[...] = jnp.where(x >= 0, one, -one)


def _binary_tanh_2d(x2d, block_rows_target):
    """Run the kernel over a lane-dense (rows, 128) slab (rows >= 1)."""
    rows = x2d.shape[0]
    dtype = x2d.dtype

    if rows <= block_rows_target:
        br = rows                      # single full-extent block
    else:
        # At least MIN_GRID_STEPS steps; rows a multiple of 32 so the same
        # block shape packs cleanly for f32 / bf16 / int8 sublane tilings.
        br = min(block_rows_target,
                 _round_up(pl.cdiv(rows, MIN_GRID_STEPS), 32))
    grid = (pl.cdiv(rows, br),)

    itemsize = jnp.dtype(dtype).itemsize
    return pl.pallas_call(
        _binary_tanh_kernel,
        out_shape=jax.ShapeDtypeStruct((rows, LANES), dtype),
        grid=grid,
        in_specs=[pl.BlockSpec((br, LANES), lambda i: (i, 0))],
        out_specs=pl.BlockSpec((br, LANES), lambda i: (i, 0)),
        compiler_params=pltpu.CompilerParams(
            # "parallel": shard row blocks across TensorCores on multi-TC
            # chips (v7x); neutral on single-TC v5e/v6e.  If a v7x trace
            # shows one idle core, escalate to pltpu.CORE_PARALLEL here.
            dimension_semantics=("parallel",),
            # 4 MiB in + 4 MiB out, double-buffered -> ~16 MiB of scratch;
            # v5e's default scoped limit is 16 MiB, so raise it explicitly.
            vmem_limit_bytes=VMEM_LIMIT_BYTES,
            # Let XLA fuse the flatten/slice producer into the Pallas input
            # read (avoids materializing an extra HBM copy of the input).
            allow_input_fusion=[True],
        ),
        cost_estimate=pl.CostEstimate(
            flops=rows * LANES,
            transcendentals=0,
            bytes_accessed=2 * rows * LANES * itemsize,
        ),
    )(x2d)


def binary_tanh(x):
    """BinaryTanh forward: sign-binarized hardtanh.  Same shape/dtype as x."""
    orig_shape = x.shape
    dtype = x.dtype
    n = x.size

    # Dtype-aware block sizing: ~TARGET_BLOCK_BYTES of input per grid step.
    itemsize = jnp.dtype(dtype).itemsize
    block_rows_target = max(
        32, (TARGET_BLOCK_BYTES // (LANES * itemsize)) // 32 * 32)

    x_flat = jnp.ravel(x)
    rem = n % LANES
    n_aligned = n - rem

    pieces = []
    if n_aligned > 0:
        # Lane-dense view of the 128-aligned bulk.  On the aligned path
        # (rem == 0) this is the whole array with no pad / slice copies.
        bulk = x_flat if rem == 0 else x_flat[:n_aligned]
        x2d = bulk.reshape(n_aligned // LANES, LANES)
        pieces.append(_binary_tanh_2d(x2d, block_rows_target).reshape(-1))
    if rem > 0:
        # Tail of < 128 elements: cheaper in plain jnp than padding the whole
        # array (which would add full-size HBM pad + output-slice copies).
        tail = x_flat[n_aligned:]
        one = jnp.ones((), dtype=dtype)
        pieces.append(jnp.where(tail >= 0, one, -one))

    out_flat = pieces[0] if len(pieces) == 1 else jnp.concatenate(pieces)
    return out_flat.reshape(orig_shape)

# TODO(synk): forward-only. Training with the straight-through estimator needs
# jax.custom_vjp with grad = g * (|x| <= 1); plain autodiff of where() is zero.


def _reference(x):
    one = jnp.ones((), dtype=x.dtype)
    return jnp.where(jnp.clip(x, -1.0, 1.0) >= 0, one, -one)


if __name__ == "__main__":
    # Primary test: NCHW activations (128-aligned element count -> pure
    # zero-copy streaming path).
    x = jax.random.normal(jax.random.PRNGKey(0), (2, 4, 16, 16),
                          dtype=jnp.float32) * 2.0
    y = jax.block_until_ready(binary_tanh(x))
    assert y.shape == x.shape and y.dtype == x.dtype
    assert bool(jnp.all(y == _reference(x)))

    # Secondary test: non-multiple-of-128 element count (prefix kernel + tail).
    x2 = jax.random.normal(jax.random.PRNGKey(1), (2, 3, 7, 5),
                           dtype=jnp.float32)
    y2 = jax.block_until_ready(binary_tanh(x2))
    assert y2.shape == x2.shape and y2.dtype == x2.dtype
    assert bool(jnp.all(y2 == _reference(x2)))

    # bf16 path (exercises dtype-aware block sizing, dtype-preserving output).
    x3 = jax.random.normal(jax.random.PRNGKey(2), (2, 4, 16, 16),
                           dtype=jnp.bfloat16)
    y3 = jax.block_until_ready(binary_tanh(x3))
    assert y3.dtype == jnp.bfloat16
    assert bool(jnp.all(y3 == _reference(x3)))

    print("KERNEL_OK")
</pallas_src>

<mosaic_0001>
module attributes {stable_mosaic.version = 11 : i64} {
  func.func @_binary_tanh_kernel(%arg0: i32, %arg1: memref<16x128xf32, #tpu.memory_space<vmem>>, %arg2: memref<16x128xf32, #tpu.memory_space<vmem>>) attributes {dimension_semantics = [#tpu.dimension_semantics<parallel>], iteration_bounds = array<i64: 1>, scalar_prefetch = 0 : i64, scratch_operands = 0 : i64, tpu.core_type = #tpu.core_type<tc>, window_params = [{transform_indices = @transform_0, window_bounds = array<i64: 16, 128>}, {transform_indices = @transform_1, window_bounds = array<i64: 16, 128>}]} {
    %c0 = arith.constant 0 : index
    %c0_0 = arith.constant 0 : index
    %0 = vector.load %arg1[%c0, %c0_0] : memref<16x128xf32, #tpu.memory_space<vmem>>, vector<16x128xf32>
    %cst = arith.constant 0.000000e+00 : f32
    %1 = vector.broadcast %cst : f32 to vector<16x128xf32>
    %2 = arith.cmpf oge, %0, %1 : vector<16x128xf32>
    %cst_1 = arith.constant 0.000000e+00 : f32
    %cst_2 = arith.constant 1.000000e+00 : f32
    %3 = arith.subf %cst_1, %cst_2 : f32
    %cst_3 = arith.constant 1.000000e+00 : f32
    %4 = vector.broadcast %cst_3 : f32 to vector<16x128xf32>
    %5 = vector.broadcast %3 : f32 to vector<16x128xf32>
    %6 = arith.select %2, %4, %5 : vector<16x128xi1>, vector<16x128xf32>
    %c0_4 = arith.constant 0 : index
    %c0_5 = arith.constant 0 : index
    %7 = vector.load %arg2[%c0_4, %c0_5] : memref<16x128xf32, #tpu.memory_space<vmem>>, vector<16x128xf32>
    tpu.vector_store %arg2[%c0_4, %c0_5], %6 {strides = array<i32>} : memref<16x128xf32, #tpu.memory_space<vmem>>, vector<16x128xf32>,
    return
  }
  func.func @transform_0(%arg0: i32) -> (i32, i32) {
    %c0_i32 = arith.constant 0 : i32
    %c0_i32_0 = arith.constant 0 : i32
    return %arg0, %c0_i32 : i32, i32
  }
  func.func @transform_1(%arg0: i32) -> (i32, i32) {
    %c0_i32 = arith.constant 0 : i32
    %c0_i32_0 = arith.constant 0 : i32
    return %arg0, %c0_i32 : i32, i32
  }
}

</mosaic_0001>

<bundles_post_ra>
// kernel: tpu_custom_call.1
= control target key start
LH: loop header
LB: loop body
LE: loop exit
PB: predicated region body
PF: predicated region fallthrough
CT: control target
= control target key end

     0   :  { %6 = vsyncpa [#allocation3], 0  ;;  %s146_s0 = inlined_call_operand.hbm [shape: f32[16,128], index: 0, kind: input, shape index: {}]   ;;  %s147_s1 = inlined_call_operand.hbm [shape: f32[16,128], index: 1, kind: output, shape index: {}]  }
   0x1   :  { %7 = vsyncpa [#allocation4], 0  ;;  %s101_s6 = smov [#allocation2]   ;;  %s53_s10 = scalar_lea.hbm %s146_s0, 256 }
   0x2   :  { %s13_s7 = sshll.u32 %s101_s6, 4  ;;  %p54_p0 = scmp.ne.s32.totalorder %s146_s0, %s53_s10  ;;  %s14_s7 = int_to_ptr.vmem [resolvable:$true] %s13_s7 }
   0x3   :  { %p57_p1 = scmp.lt.u32.totalorder %s53_s10, %s146_s0 }
   0x5   :  { %p59_p2 = pnand %p57_p1, %p54_p0 }
   0x7   :  { %62 = shalt.err (!%p59_p2)
}
   0x8   :  { %s63_s15 = scalar_lea.vmem %s14_s7, 256  ;;  %p68_p4 = scmp.lt.s32.totalorder %s14_s7, %s14_s7 }
   0x9   :  { %p64_p3 = scmp.ne.s32.totalorder %s14_s7, %s63_s15  ;;  %p69_p5 = scmp.lt.s32.totalorder %s63_s15, %s63_s15 }
   0xb   :  { %p70_p6 = por %p69_p5, %p68_p4 }
   0xd   :  { %p71_p7 = pnand %p70_p6, %p64_p3 }
   0xf   :  { %74 = shalt.err (!%p71_p7)
}
  0x10   :  { %s102_s16 = smov 128   ;;  %s103_s17 = smov 8  }
  0x11   :  { %19 = dma.hbm_to_vmem [thread:$0]  %s146_s0, 256, %s14_s7, [#allocation3], %s102_s16, %s102_s16, %s103_s17  }
  0x12   :  { %97 = dma.done.wait [#allocation3], 256  }
  0x13   :  { %98 = vsyncadd [#allocation3], 4294967040  ;;  %s104_s20 = smov [#allocation5]   ;;  %v23_v0 = vld [vmem:[#allocation2] sm:$0xff]  ;;  %v24_v1 = vld [vmem:[#allocation2 + $0x8] sm:$0xff]  ;;  %v105_v2 = vmov -1.0  }
  0x14   :  { %s36_s21 = sshll.u32 %s104_s20, 4  ;;  %vm25_vm0 = vcmp.ge.f32.partialorder %v23_v0, 0.0  ;;  %vm26_vm1 = vcmp.ge.f32.partialorder %v24_v1, 0.0  ;;  %s37_s21 = int_to_ptr.vmem [resolvable:$true] %s36_s21 }
  0x15   :  { %v27_v3 = vsel %vm25_vm0, 1.0, %v105_v2  ;;  %v28_v4 = vsel %vm26_vm1, 1.0, %v105_v2  ;;  %s75_s22 = scalar_lea.vmem %s37_s21, 256  ;;  %p80_p9 = scmp.lt.s32.totalorder %s37_s21, %s37_s21 }
  0x16   :  { %29 = vst [vmem:[#allocation5] sm:$0xff] %v27_v3  ;;  %30 = vst [vmem:[#allocation5 + $0x8] sm:$0xff] %v28_v4  ;;  %p76_p8 = scmp.ne.s32.totalorder %s37_s21, %s75_s22  ;;  %p81_p10 = scmp.lt.s32.totalorder %s75_s22, %s75_s22 }
  0x18   :  { %p82_p11 = por %p81_p10, %p80_p9 }
  0x1a   :  { %p83_p12 = pnand %p82_p11, %p76_p8 }
  0x1c   :  { %86 = shalt.err (!%p83_p12)
}
  0x1d   :  { %s87_s24 = scalar_lea.hbm %s147_s1, 256 }
  0x1e   :  { %p88_p13 = scmp.ne.s32.totalorder %s147_s1, %s87_s24  ;;  %p91_p0 = scmp.lt.u32.totalorder %s87_s24, %s147_s1 }
  0x20   :  { %p93_p1 = pnand %p91_p0, %p88_p13 }
  0x22   :  { %96 = shalt.err (!%p93_p1)
}
  0x23   :  { %42 = dma.vmem_to_hbm [thread:$0]  %s37_s21, 256, %s147_s1, [#allocation4], %s102_s16, %s102_s16, %s103_s17  }
  0x24   :  { %99 = dma.done.wait [#allocation4], 256  }
  0x25   :  { %100 = vsyncadd [#allocation4], 4294967040 }
  0x26   :  { %46 = vsyncpa [#allocation3], 1 }
  0x27   :  { %47 = vsyncpa [#allocation4], 1 }

</bundles_post_ra>
